<compile_context>
chip_gen: v7x
topology: tpu7x:2x2x1
jax: 0.10.0
libtpu: 0.0.40
codegen_flags: <defaults>
</compile_context>

<pallas_src>
import jax
import jax.numpy as jnp
from jax.experimental import pallas as pl
from jax.experimental.pallas import tpu as pltpu

_LANE = 128   # lane width (last dim)
_SUBLANE = 8  # f32 sublane width (second-to-last dim)


def _round_up(n, m):
    return (n + m - 1) // m * m


def qnet_kernel(x_ref, w1_ref, b1_ref, w2_ref, b2_ref, w3_ref, b3_ref, out_ref):
    # Fused hot path on one batch tile: three MXU matmuls (bf16 in, f32 acc)
    # with bias add + ReLU on the VPU in f32.
    x = x_ref[...]                                      # bf16 [tile, in_dim]
    h1 = jnp.dot(x, w1_ref[...], preferred_element_type=jnp.float32) + b1_ref[...]
    h1 = jnp.maximum(h1, 0.0)
    h2 = jnp.dot(h1.astype(w2_ref.dtype), w2_ref[...],
                 preferred_element_type=jnp.float32) + b2_ref[...]
    h2 = jnp.maximum(h2, 0.0)
    y = jnp.dot(h2.astype(w3_ref.dtype), w3_ref[...],
                preferred_element_type=jnp.float32) + b3_ref[...]
    out_ref[...] = y.astype(out_ref.dtype)              # lane-dense unmasked store


def qnet_forward(x, params, *, batch_tile=None):
    """x: [B, input_dim] float32.  params: dict of w1,b1,w2,b2,w3,b3 ([in,out] / [1,out])."""
    B, in_dim = x.shape
    hid = params["w1"].shape[1]
    out_dim = params["w3"].shape[1]

    # ---- lane-dense padding of feature dims (zero pad is exact: ReLU(0)=0) ----
    hid_p = _round_up(hid, _LANE)
    out_p = _round_up(out_dim, _LANE)

    w1 = jnp.pad(params["w1"], ((0, 0), (0, hid_p - hid))).astype(jnp.bfloat16)
    b1 = jnp.pad(params["b1"], ((0, 0), (0, hid_p - hid))).astype(jnp.float32)
    w2 = jnp.pad(params["w2"], ((0, hid_p - hid), (0, hid_p - hid))).astype(jnp.bfloat16)
    b2 = jnp.pad(params["b2"], ((0, 0), (0, hid_p - hid))).astype(jnp.float32)
    w3 = jnp.pad(params["w3"], ((0, hid_p - hid), (0, out_p - out_dim))).astype(jnp.bfloat16)
    b3 = jnp.pad(params["b3"], ((0, 0), (0, out_p - out_dim))).astype(jnp.float32)

    # ---- batch tiling: big tiles to amortize per-grid-step overhead ----
    if batch_tile is None:
        # whole batch in one step for small B; cap at 512 rows (85%+ of HBM
        # roofline per measured data) for large B.
        batch_tile = min(512, _round_up(B, _SUBLANE))
    batch_tile = _round_up(batch_tile, _SUBLANE)
    B_p = _round_up(B, batch_tile)
    x_p = jnp.pad(x, ((0, B_p - B), (0, 0))).astype(jnp.bfloat16)

    grid = (B_p // batch_tile,)

    # Weights/biases are tiny and never change across grid steps: constant
    # index maps keep them resident in VMEM.
    full = lambda shape: pl.BlockSpec(shape, lambda i: (0, 0))

    out_padded = pl.pallas_call(
        qnet_kernel,
        out_shape=jax.ShapeDtypeStruct((B_p, out_p), jnp.float32),
        grid_spec=pltpu.PrefetchScalarGridSpec(
            num_scalar_prefetch=0,
            grid=grid,
            in_specs=[
                pl.BlockSpec((batch_tile, in_dim), lambda i: (i, 0)),  # x tile
                full((in_dim, hid_p)),   # w1 (bf16)
                full((1, hid_p)),        # b1 (f32)
                full((hid_p, hid_p)),    # w2 (bf16)
                full((1, hid_p)),        # b2 (f32)
                full((hid_p, out_p)),    # w3 (bf16)
                full((1, out_p)),        # b3 (f32)
            ],
            out_specs=pl.BlockSpec((batch_tile, out_p), lambda i: (i, 0)),
        ),
        compiler_params=pltpu.CompilerParams(
            dimension_semantics=("parallel",),  # v7x: shards batch steps over both TCs
        ),
    )(x_p, w1, b1, w2, b2, w3, b3)

    # Strip batch / output-lane padding.
    return out_padded[:B, :out_dim]


def init_params(key, input_dim, hidden_dim, output_dim):
    """Deterministic init mirroring nn.Linear (stored transposed: [in, out])."""
    k1, k2, k3, k4, k5, k6 = jax.random.split(key, 6)

    def linear(kw, kb, fan_in, fan_out):
        # PyTorch default: U(-1/sqrt(fan_in), 1/sqrt(fan_in)) for both W and b.
        bound = 1.0 / jnp.sqrt(fan_in)
        w = jax.random.uniform(kw, (fan_in, fan_out), jnp.float32, -bound, bound)
        b = jax.random.uniform(kb, (1, fan_out), jnp.float32, -bound, bound)
        return w, b

    w1, b1 = linear(k1, k2, input_dim, hidden_dim)
    w2, b2 = linear(k3, k4, hidden_dim, hidden_dim)
    w3, b3 = linear(k5, k6, hidden_dim, output_dim)
    return {"w1": w1, "b1": b1, "w2": w2, "b2": b2, "w3": w3, "b3": b3}


def qnet_ref(x, p):
    """Pure-JAX f32 reference for correctness check."""
    h1 = jnp.maximum(x @ p["w1"] + p["b1"], 0.0)
    h2 = jnp.maximum(h1 @ p["w2"] + p["b2"], 0.0)
    return h2 @ p["w3"] + p["b3"]


if __name__ == "__main__":
    key = jax.random.PRNGKey(0)
    k_params, k_x = jax.random.split(key)

    input_dim, hidden_dim, output_dim = 16, 32, 4
    batch = 16

    params = init_params(k_params, input_dim, hidden_dim, output_dim)
    x = jax.random.normal(k_x, (batch, input_dim), jnp.float32)

    out = qnet_forward(x, params)
    out = jax.block_until_ready(out)

    ref = qnet_ref(x, params)
    assert out.shape == (batch, output_dim)
    # bf16 inputs/weights (f32 accumulation) -> loosened tolerance vs f32 reference.
    assert jnp.allclose(out, ref, atol=2e-2, rtol=2e-2), "mismatch vs reference"

    print("KERNEL_OK")
</pallas_src>

<mosaic_0001>
module attributes {stable_mosaic.version = 11 : i64} {
  func.func @qnet_kernel(%arg0: i32, %arg1: memref<16x16xbf16, #tpu.memory_space<vmem>>, %arg2: memref<16x128xbf16, #tpu.memory_space<vmem>>, %arg3: memref<1x128xf32, #tpu.memory_space<vmem>>, %arg4: memref<128x128xbf16, #tpu.memory_space<vmem>>, %arg5: memref<1x128xf32, #tpu.memory_space<vmem>>, %arg6: memref<128x128xbf16, #tpu.memory_space<vmem>>, %arg7: memref<1x128xf32, #tpu.memory_space<vmem>>, %arg8: memref<16x128xf32, #tpu.memory_space<vmem>>) attributes {dimension_semantics = [#tpu.dimension_semantics<parallel>], iteration_bounds = array<i64: 1>, scalar_prefetch = 0 : i64, scratch_operands = 0 : i64, tpu.core_type = #tpu.core_type<tc>, window_params = [{transform_indices = @transform_0, window_bounds = array<i64: 16, 16>}, {pipeline_mode = #tpu.pipeline_mode<synchronous>, transform_indices = @transform_1, window_bounds = array<i64: 16, 128>}, {pipeline_mode = #tpu.pipeline_mode<synchronous>, transform_indices = @transform_2, window_bounds = array<i64: 1, 128>}, {pipeline_mode = #tpu.pipeline_mode<synchronous>, transform_indices = @transform_3, window_bounds = array<i64: 128, 128>}, {pipeline_mode = #tpu.pipeline_mode<synchronous>, transform_indices = @transform_4, window_bounds = array<i64: 1, 128>}, {pipeline_mode = #tpu.pipeline_mode<synchronous>, transform_indices = @transform_5, window_bounds = array<i64: 128, 128>}, {pipeline_mode = #tpu.pipeline_mode<synchronous>, transform_indices = @transform_6, window_bounds = array<i64: 1, 128>}, {transform_indices = @transform_7, window_bounds = array<i64: 16, 128>}]} {
    %c0 = arith.constant 0 : index
    %c0_0 = arith.constant 0 : index
    %0 = vector.load %arg1[%c0, %c0_0] : memref<16x16xbf16, #tpu.memory_space<vmem>>, vector<16x16xbf16>
    %c0_1 = arith.constant 0 : index
    %c0_2 = arith.constant 0 : index
    %1 = vector.load %arg2[%c0_1, %c0_2] : memref<16x128xbf16, #tpu.memory_space<vmem>>, vector<16x128xbf16>
    %cst = arith.constant dense<0.000000e+00> : vector<16x128xf32>
    %2 = tpu.matmul %0, %1, %cst {dimension_numbers = #tpu.dot_dimension_numbers<[1], [0], [0], [1], [0, 0, 1, 1], [], []>} : vector<16x16xbf16>, vector<16x128xbf16>, vector<16x128xf32> -> vector<16x128xf32>
    %c0_3 = arith.constant 0 : index
    %c0_4 = arith.constant 0 : index
    %3 = vector.load %arg3[%c0_3, %c0_4] : memref<1x128xf32, #tpu.memory_space<vmem>>, vector<1x128xf32>
    %4 = vector.broadcast %3 : vector<1x128xf32> to vector<16x128xf32>
    %5 = arith.addf %2, %4 : vector<16x128xf32>
    %cst_5 = arith.constant 0.000000e+00 : f32
    %6 = vector.broadcast %cst_5 : f32 to vector<16x128xf32>
    %7 = arith.maximumf %5, %6 : vector<16x128xf32>
    %8 = arith.truncf %7 : vector<16x128xf32> to vector<16x128xbf16>
    %c0_6 = arith.constant 0 : index
    %c0_7 = arith.constant 0 : index
    %9 = vector.load %arg4[%c0_6, %c0_7] : memref<128x128xbf16, #tpu.memory_space<vmem>>, vector<128x128xbf16>
    %cst_8 = arith.constant dense<0.000000e+00> : vector<16x128xf32>
    %10 = tpu.matmul %8, %9, %cst_8 {dimension_numbers = #tpu.dot_dimension_numbers<[1], [0], [0], [1], [0, 0, 1, 1], [], []>} : vector<16x128xbf16>, vector<128x128xbf16>, vector<16x128xf32> -> vector<16x128xf32>
    %c0_9 = arith.constant 0 : index
    %c0_10 = arith.constant 0 : index
    %11 = vector.load %arg5[%c0_9, %c0_10] : memref<1x128xf32, #tpu.memory_space<vmem>>, vector<1x128xf32>
    %12 = vector.broadcast %11 : vector<1x128xf32> to vector<16x128xf32>
    %13 = arith.addf %10, %12 : vector<16x128xf32>
    %cst_11 = arith.constant 0.000000e+00 : f32
    %14 = vector.broadcast %cst_11 : f32 to vector<16x128xf32>
    %15 = arith.maximumf %13, %14 : vector<16x128xf32>
    %16 = arith.truncf %15 : vector<16x128xf32> to vector<16x128xbf16>
    %c0_12 = arith.constant 0 : index
    %c0_13 = arith.constant 0 : index
    %17 = vector.load %arg6[%c0_12, %c0_13] : memref<128x128xbf16, #tpu.memory_space<vmem>>, vector<128x128xbf16>
    %cst_14 = arith.constant dense<0.000000e+00> : vector<16x128xf32>
    %18 = tpu.matmul %16, %17, %cst_14 {dimension_numbers = #tpu.dot_dimension_numbers<[1], [0], [0], [1], [0, 0, 1, 1], [], []>} : vector<16x128xbf16>, vector<128x128xbf16>, vector<16x128xf32> -> vector<16x128xf32>
    %c0_15 = arith.constant 0 : index
    %c0_16 = arith.constant 0 : index
    %19 = vector.load %arg7[%c0_15, %c0_16] : memref<1x128xf32, #tpu.memory_space<vmem>>, vector<1x128xf32>
    %20 = vector.broadcast %19 : vector<1x128xf32> to vector<16x128xf32>
    %21 = arith.addf %18, %20 : vector<16x128xf32>
    %c0_17 = arith.constant 0 : index
    %c0_18 = arith.constant 0 : index
    %22 = vector.load %arg8[%c0_17, %c0_18] : memref<16x128xf32, #tpu.memory_space<vmem>>, vector<16x128xf32>
    tpu.vector_store %arg8[%c0_17, %c0_18], %21 {strides = array<i32>} : memref<16x128xf32, #tpu.memory_space<vmem>>, vector<16x128xf32>,
    return
  }
  func.func @transform_0(%arg0: i32) -> (i32, i32) {
    %c0_i32 = arith.constant 0 : i32
    %c0_i32_0 = arith.constant 0 : i32
    return %arg0, %c0_i32 : i32, i32
  }
  func.func @transform_1(%arg0: i32) -> (i32, i32) {
    %c0_i32 = arith.constant 0 : i32
    %c0_i32_0 = arith.constant 0 : i32
    %c0_i32_1 = arith.constant 0 : i32
    return %c0_i32, %c0_i32_0 : i32, i32
  }
  func.func @transform_2(%arg0: i32) -> (i32, i32) {
    %c0_i32 = arith.constant 0 : i32
    %c0_i32_0 = arith.constant 0 : i32
    %c0_i32_1 = arith.constant 0 : i32
    return %c0_i32, %c0_i32_0 : i32, i32
  }
  func.func @transform_3(%arg0: i32) -> (i32, i32) {
    %c0_i32 = arith.constant 0 : i32
    %c0_i32_0 = arith.constant 0 : i32
    %c0_i32_1 = arith.constant 0 : i32
    return %c0_i32, %c0_i32_0 : i32, i32
  }
  func.func @transform_4(%arg0: i32) -> (i32, i32) {
    %c0_i32 = arith.constant 0 : i32
    %c0_i32_0 = arith.constant 0 : i32
    %c0_i32_1 = arith.constant 0 : i32
    return %c0_i32, %c0_i32_0 : i32, i32
  }
  func.func @transform_5(%arg0: i32) -> (i32, i32) {
    %c0_i32 = arith.constant 0 : i32
    %c0_i32_0 = arith.constant 0 : i32
    %c0_i32_1 = arith.constant 0 : i32
    return %c0_i32, %c0_i32_0 : i32, i32
  }
  func.func @transform_6(%arg0: i32) -> (i32, i32) {
    %c0_i32 = arith.constant 0 : i32
    %c0_i32_0 = arith.constant 0 : i32
    %c0_i32_1 = arith.constant 0 : i32
    return %c0_i32, %c0_i32_0 : i32, i32
  }
  func.func @transform_7(%arg0: i32) -> (i32, i32) {
    %c0_i32 = arith.constant 0 : i32
    %c0_i32_0 = arith.constant 0 : i32
    return %arg0, %c0_i32 : i32, i32
  }
}

</mosaic_0001>

<bundles_post_ra>
// kernel: tpu_custom_call.1
= control target key start
LH: loop header
LB: loop body
LE: loop exit
PB: predicated region body
PF: predicated region fallthrough
CT: control target
= control target key end

     0   :  { %12 = vsyncpa [#allocation3], 0  ;;  %s802_s0 = inlined_call_operand.hbm [shape: bf16[16,16], index: 0, kind: input, shape index: {}]   ;;  %s803_s1 = inlined_call_operand.hbm [shape: bf16[16,128], index: 1, kind: input, shape index: {}]   ;;  %s804_s2 = inlined_call_operand.vmem [shape: f32[1,128], index: 2, kind: input, shape index: {}]   ;;  %s805_s3 = inlined_call_operand.hbm [shape: bf16[128,128], index: 3, kind: input, shape index: {}]   ;;  %s806_s4 = inlined_call_operand.vmem [shape: f32[1,128], index: 4, kind: input, shape index: {}]   ;;  %s807_s5 = inlined_call_operand.hbm [shape: bf16[128,128], index: 5, kind: input, shape index: {}]   ;;  %s808_s6 = inlined_call_operand.vmem [shape: f32[1,128], index: 6, kind: input, shape index: {}]   ;;  %s809_s7 = inlined_call_operand.hbm [shape: f32[16,128], index: 7, kind: output, shape index: {}]  }
   0x1   :  { %13 = vsyncpa [#allocation6], 0 }
   0x2   :  { %14 = vsyncpa [#allocation9], 0 }
   0x3   :  { %15 = vsyncpa [#allocation4], 0  ;;  %s636_s24 = smov [#allocation5]   ;;  %s637_s26 = smov [#allocation2]  }
   0x4   :  { %s33_s25 = sshll.u32 %s636_s24, 4  ;;  %s21_s27 = sshll.u32 %s637_s26, 4  ;;  %s34_s25 = int_to_ptr.vmem [resolvable:$true] %s33_s25  ;;  %s687_s27 = int_to_ptr.vmem [resolvable:$true] %s21_s27 }
   0x5   :  { %s518_s30 = scalar_lea.hbm %s803_s1, 128 }
   0x6   :  { %p519_p0 = scmp.ne.s32.totalorder %s803_s1, %s518_s30  ;;  %p522_p1 = scmp.lt.u32.totalorder %s518_s30, %s803_s1 }
   0x8   :  { %p524_p2 = pnand %p522_p1, %p519_p0 }
   0xa   :  { %527 = shalt.err (!%p524_p2)
}
   0xb   :  { %s528_s12 = scalar_lea.vmem %s34_s25, 128  ;;  %p533_p4 = scmp.lt.s32.totalorder %s34_s25, %s34_s25 }
   0xc   :  { %p529_p3 = scmp.ne.s32.totalorder %s34_s25, %s528_s12  ;;  %p534_p5 = scmp.lt.s32.totalorder %s528_s12, %s528_s12 }
   0xe   :  { %p535_p6 = por %p534_p5, %p533_p4 }
  0x10   :  { %p536_p7 = pnand %p535_p6, %p529_p3 }
  0x12   :  { %539 = shalt.err (!%p536_p7)
}
  0x13   :  { %s638_s13 = smov 64   ;;  %s639_s14 = smov 4  }
  0x14   :  { %39 = dma.hbm_to_vmem [thread:$0]  %s803_s1, 128, %s34_s25, [#allocation6], %s638_s13, %s638_s13, %s639_s14  }
  0x15   :  { %s540_s19 = scalar_lea.hbm %s802_s0, 128 }
  0x16   :  { %p541_p8 = scmp.ne.s32.totalorder %s802_s0, %s540_s19  ;;  %p544_p9 = scmp.lt.u32.totalorder %s540_s19, %s802_s0 }
  0x18   :  { %p546_p10 = pnand %p544_p9, %p541_p8 }
  0x1a   :  { %549 = shalt.err (!%p546_p10)
}
  0x1b   :  { %s550_s24 = scalar_lea.vmem %s687_s27, 128  ;;  %p555_p12 = scmp.lt.s32.totalorder %s687_s27, %s687_s27 }
  0x1c   :  { %p551_p11 = scmp.ne.s32.totalorder %s687_s27, %s550_s24  ;;  %p556_p13 = scmp.lt.s32.totalorder %s550_s24, %s550_s24 }
  0x1e   :  { %p557_p0 = por %p556_p13, %p555_p12 }
  0x20   :  { %p558_p1 = pnand %p557_p0, %p551_p11 }
  0x22   :  { %561 = shalt.err (!%p558_p1)
}
  0x23   :  { %27 = dma.hbm_to_vmem [thread:$0]  %s802_s0, 128, %s687_s27, [#allocation3], %s638_s13, %s638_s13, %s639_s14  }
  0x24   :  { %s640_s26 = smov [#allocation7]   ;;  %s641_s29 = smov [#allocation8]  }
  0x25   :  { %s47_s28 = sshll.u32 %s640_s26, 4  ;;  %s61_s30 = sshll.u32 %s641_s29, 4  ;;  %s48_s28 = int_to_ptr.vmem [resolvable:$true] %s47_s28  ;;  %s724_s30 = int_to_ptr.vmem [resolvable:$true] %s61_s30 }
  0x26   :  { %s562_s10 = scalar_lea.hbm %s805_s3, 1024 }
  0x27   :  { %p563_p2 = scmp.ne.s32.totalorder %s805_s3, %s562_s10  ;;  %p566_p3 = scmp.lt.u32.totalorder %s562_s10, %s805_s3 }
  0x29   :  { %p568_p4 = pnand %p566_p3, %p563_p2 }
  0x2b   :  { %571 = shalt.err (!%p568_p4)
}
  0x2c   :  { %s572_s0 = scalar_lea.vmem %s48_s28, 1024  ;;  %p577_p6 = scmp.lt.s32.totalorder %s48_s28, %s48_s28 }
  0x2d   :  { %p573_p5 = scmp.ne.s32.totalorder %s48_s28, %s572_s0  ;;  %p578_p7 = scmp.lt.s32.totalorder %s572_s0, %s572_s0 }
  0x2f   :  { %p579_p8 = por %p578_p7, %p577_p6 }
  0x31   :  { %p580_p9 = pnand %p579_p8, %p573_p5 }
  0x33   :  { %583 = shalt.err (!%p580_p9)
}
  0x34   :  { %53 = dma.hbm_to_vmem [thread:$0]  %s805_s3, 1024, %s48_s28, [#allocation6], %s638_s13, %s638_s13, %s639_s14  }
  0x35   :  { %s584_s20 = scalar_lea.hbm %s807_s5, 1024 }
  0x36   :  { %p585_p10 = scmp.ne.s32.totalorder %s807_s5, %s584_s20  ;;  %p588_p11 = scmp.lt.u32.totalorder %s584_s20, %s807_s5 }
  0x38   :  { %p590_p12 = pnand %p588_p11, %p585_p10 }
  0x3a   :  { %593 = shalt.err (!%p590_p12)
}
  0x3b   :  { %s594_s1 = scalar_lea.vmem %s724_s30, 1024  ;;  %p599_p0 = scmp.lt.s32.totalorder %s724_s30, %s724_s30 }
  0x3c   :  { %p595_p13 = scmp.ne.s32.totalorder %s724_s30, %s594_s1  ;;  %p600_p1 = scmp.lt.s32.totalorder %s594_s1, %s594_s1 }
  0x3e   :  { %p601_p2 = por %p600_p1, %p599_p0 }
  0x40   :  { %p602_p3 = pnand %p601_p2, %p595_p13 }
  0x42   :  { %605 = shalt.err (!%p602_p3)
}
  0x43   :  { %67 = dma.hbm_to_vmem [thread:$0]  %s807_s5, 1024, %s724_s30, [#allocation9], %s638_s13, %s638_s13, %s639_s14  }
  0x44   :  { %628 = dma.done.wait [#allocation3], 128  }
  0x45   :  { %629 = vsyncadd [#allocation3], 4294967168 }
  0x46   :  { %630 = dma.done.wait [#allocation6], 1152  }
  0x47   :  { %631 = vsyncadd [#allocation6], 4294966144 }
  0x48   :  { %632 = dma.done.wait [#allocation9], 1024  }
  0x49   :  { %633 = vsyncadd [#allocation9], 4294966272  ;;  %v642_v0 = vmov 0.0   ;;  %vm643_vm0 = vmmov 0   ;;  %v500_v1 = vld [vmem:[#allocation5] sm:$0xff]   ;;  %v501_v2 = vld [vmem:[#allocation2] sm:$0xff]  }
  0x4a   :  { %443 = vmatprep.subr.bf16.mxu0 %v642_v0  ;;  %445 = vmatprep.mubr.msk.bf16.mxu0 %vm643_vm0, %v642_v0  ;;  %vm105_vm1 = vcmask 130048   ;;  %v502_v3 = vld [vmem:[#allocation7] sm:$0xff]   ;;  %v503_v4 = vld [vmem:[#allocation7 + $0x8] sm:$0xff]   ;;  %v504_v5 = vld [vmem:[#allocation7 + $0x10] sm:$0xff]   ;;  %s644_s29 = smov [#allocation10]  }
  0x4b   :  { %449 = vmatprep.subr.bf16.mxu1 %v642_v0  ;;  %465 = vmatprep.mubr.msk.bf16.mxu1 %vm643_vm0, %v642_v0  ;;  %v505_v6 = vld [vmem:[#allocation7 + $0x18] sm:$0xff]   ;;  %v506_v7 = vld [vmem:[#allocation7 + $0x20] sm:$0xff]   ;;  %v507_v8 = vld [vmem:[#allocation7 + $0x28] sm:$0xff]   ;;  %s387_s30 = sshll.u32 %s644_s29, 4  ;;  %s388_s30 = int_to_ptr.vmem [resolvable:$true] %s387_s30 }
  0x4c   :  { %444 = vmatpush3.bf16.msra.mxu0 %v500_v1  ;;  %450 = vmatpush3.bf16.msra.mxu1 %v502_v3  ;;  %v508_v9 = vld [vmem:[#allocation7 + $0x30] sm:$0xff]   ;;  %v509_v10 = vld [vmem:[#allocation7 + $0x38] sm:$0xff]   ;;  %v510_v11 = vld [vmem:[#allocation8] sm:$0xff]   ;;  %p611_p5 = scmp.lt.s32.totalorder %s388_s30, %s388_s30 }
  0x4d   :  { %469 = vmatprep.subr.bf16.mxu0 %v642_v0  ;;  %451 = vmatprep.subr.bf16.mxu1 %v642_v0  ;;  %v511_v12 = vld [vmem:[#allocation8 + $0x8] sm:$0xff]   ;;  %v512_v13 = vld [vmem:[#allocation8 + $0x10] sm:$0xff]   ;;  %v513_v14 = vld [vmem:[#allocation8 + $0x18] sm:$0xff]  }
  0x4e   :  { %v514_v15 = vld [vmem:[#allocation8 + $0x20] sm:$0xff]   ;;  %v515_v16 = vld [vmem:[#allocation8 + $0x28] sm:$0xff]   ;;  %v401_v17 = vld [vmem:[%s804_s2] ss:$0 sm:$0xff] }
  0x4f   :  { %446 = vmatmul.mubr.msk.bf16.vlgmr.msra.gmra.mrb[0].mxu0 %vm105_vm1, %v501_v2  ;;  %v516_v27 = vld [vmem:[#allocation8 + $0x30] sm:$0xff]   ;;  %v517_v28 = vld [vmem:[#allocation8 + $0x38] sm:$0xff]  }
  0x50   :  { %485 = vmatprep.mubr.msk.bf16.mxu0 %vm643_vm0, %v642_v0  ;;  %452 = vmatpush3.bf16.msra.mxu1 %v503_v4  ;;  %v405_v29 = vld [vmem:[%s806_s4] ss:$0 sm:$0xff]  ;;  %s606_s4 = scalar_lea.vmem %s388_s30, 256 }
  0x51   :  { %453 = vmatprep.subr.bf16.mxu1 %v642_v0  ;;  %470 = vmatpush3.bf16.msra.mxu0 %v510_v11  ;;  %v414_v39 = vld [vmem:[%s808_s6] ss:$0 sm:$0xff]  ;;  %p607_p4 = scmp.ne.s32.totalorder %s388_s30, %s606_s4  ;;  %p612_p6 = scmp.lt.s32.totalorder %s606_s4, %s606_s4 }
  0x52   :  { %471 = vmatprep.subr.bf16.mxu0 %v642_v0 }
  0x53   :  { %p613_p7 = por %p612_p6, %p611_p5 }
  0x54   :  { %454 = vmatpush3.bf16.msra.mxu1 %v504_v5 }
  0x55   :  { %455 = vmatprep.subr.bf16.mxu1 %v642_v0  ;;  %472 = vmatpush3.bf16.msra.mxu0 %v511_v12  ;;  %p614_p8 = pnand %p613_p7, %p607_p4 }
  0x56   :  { %473 = vmatprep.subr.bf16.mxu0 %v642_v0 }
  0x58   :  { %456 = vmatpush3.bf16.msra.mxu1 %v505_v6 }
  0x59   :  { %457 = vmatprep.subr.bf16.mxu1 %v642_v0  ;;  %474 = vmatpush3.bf16.msra.mxu0 %v512_v13 }
  0x5a   :  { %475 = vmatprep.subr.bf16.mxu0 %v642_v0 }
  0x5c   :  { %458 = vmatpush3.bf16.msra.mxu1 %v506_v7 }
  0x5d   :  { %459 = vmatprep.subr.bf16.mxu1 %v642_v0  ;;  %476 = vmatpush3.bf16.msra.mxu0 %v513_v14 }
  0x5e   :  { %477 = vmatprep.subr.bf16.mxu0 %v642_v0 }
  0x60   :  { %460 = vmatpush3.bf16.msra.mxu1 %v507_v8 }
  0x61   :  { %461 = vmatprep.subr.bf16.mxu1 %v642_v0  ;;  %478 = vmatpush3.bf16.msra.mxu0 %v514_v15 }
  0x62   :  { %479 = vmatprep.subr.bf16.mxu0 %v642_v0 }
  0x64   :  { %462 = vmatpush3.bf16.msra.mxu1 %v508_v9 }
  0x65   :  { %463 = vmatprep.subr.bf16.mxu1 %v642_v0  ;;  %480 = vmatpush3.bf16.msra.mxu0 %v515_v16 }
  0x66   :  { %481 = vmatprep.subr.bf16.mxu0 %v642_v0 }
  0x68   :  { %464 = vmatpush3.bf16.msra.mxu1 %v509_v10 }
  0x69   :  { %482 = vmatpush3.bf16.msra.mxu0 %v516_v27 }
  0x6a   :  { %483 = vmatprep.subr.bf16.mxu0 %v642_v0 }
  0x6d   :  { %484 = vmatpush3.bf16.msra.mxu0 %v517_v28 }
 0x122   :  { %v143_v18 = vpop.f32.mrb[0].mxu0 }
 0x123   :  { %v144_v19 = vadd.f32 %v401_v17, %v143_v18  ;;  %v447_v20 = vpop.f32.mrb[1].mxu0 }
 0x124   :  { %v146_v21 = vpop.f32.mrb[2].mxu0 }
 0x125   :  { %v147_v22 = vadd.f32 %v401_v17, %v146_v21  ;;  %v448_v23 = vpop.f32.mrb[3].mxu0  ;;  %v150_v24 = vmax.f32 %v144_v19, 0.0 }
 0x127   :  { %v151_v25 = vmax.f32 %v147_v22, 0.0 }
 0x129   :  { %v152_v26 = vpack.c.bf16 %v151_v25, %v150_v24 }
 0x12b   :  { %466 = vmatmul.mubr.bf16.vlgmr.msra.gmra.mrb[0].mxu1 %v152_v26 }
 0x1fe   :  { %v258_v30 = vpop.f32.mrb[0].mxu1 }
 0x1ff   :  { %v259_v31 = vadd.f32 %v405_v29, %v258_v30  ;;  %v467_v32 = vpop.f32.mrb[1].mxu1 }
 0x200   :  { %v261_v33 = vpop.f32.mrb[2].mxu1 }
 0x201   :  { %v262_v34 = vadd.f32 %v405_v29, %v261_v33  ;;  %v468_v35 = vpop.f32.mrb[3].mxu1  ;;  %v265_v36 = vmax.f32 %v259_v31, 0.0 }
 0x203   :  { %v266_v37 = vmax.f32 %v262_v34, 0.0 }
 0x205   :  { %v267_v38 = vpack.c.bf16 %v266_v37, %v265_v36 }
 0x207   :  { %486 = vmatmul.mubr.bf16.vlgmr.msra.gmra.mrb[4].mxu0 %v267_v38 }
 0x2da   :  { %v373_v40 = vpop.f32.mrb[4].mxu0 }
 0x2db   :  { %v374_v41 = vadd.f32 %v414_v39, %v373_v40  ;;  %v487_v42 = vpop.f32.mrb[5].mxu0 }
 0x2dc   :  { %v376_v43 = vpop.f32.mrb[6].mxu0 }
 0x2dd   :  { %380 = vst [vmem:[#allocation10] sm:$0xff] %v374_v41  ;;  %v377_v44 = vadd.f32 %v414_v39, %v376_v43  ;;  %v488_v45 = vpop.f32.mrb[7].mxu0 }
 0x2df   :  { %381 = vst [vmem:[#allocation10 + $0x8] sm:$0xff] %v377_v44 }
 0x2e0   :  { %617 = shalt.err (!%p614_p8)
}
 0x2e1   :  { %s618_s9 = scalar_lea.hbm %s809_s7, 256 }
 0x2e2   :  { %p619_p9 = scmp.ne.s32.totalorder %s809_s7, %s618_s9  ;;  %p622_p10 = scmp.lt.u32.totalorder %s618_s9, %s809_s7 }
 0x2e4   :  { %p624_p11 = pnand %p622_p10, %p619_p9 }
 0x2e6   :  { %627 = shalt.err (!%p624_p11)
}
 0x2e7   :  { %s645_s16 = smov 128   ;;  %s646_s0 = smov 8  }
 0x2e8   :  { %393 = dma.vmem_to_hbm [thread:$0]  %s388_s30, 256, %s809_s7, [#allocation4], %s645_s16, %s645_s16, %s646_s0  }
 0x2e9   :  { %634 = dma.done.wait [#allocation4], 256  }
 0x2ea   :  { %635 = vsyncadd [#allocation4], 4294967040 }
 0x2eb   :  { %397 = vsyncpa [#allocation3], 1 }
 0x2ec   :  { %398 = vsyncpa [#allocation6], 1 }
 0x2ed   :  { %399 = vsyncpa [#allocation9], 1 }
 0x2ee   :  { %400 = vsyncpa [#allocation4], 1 }

</bundles_post_ra>
